<compile_context>
chip_gen: v5e
topology: v5e:2x2
jax: 0.10.0
libtpu: 0.0.40
codegen_flags: <defaults>
</compile_context>

<pallas_src>
import jax
import jax.numpy as jnp
from jax.experimental import pallas as pl
from jax.experimental.pallas import tpu as pltpu

_LANE = 128
_BF16_SUBLANE = 16  # a bf16 vreg holds (16, 128): round batch tiles to 16 rows


def _round_up(x, m):
    return ((x + m - 1) // m) * m


def _mlp_kernel(x_ref, w1_ref, b1_ref, w2_ref, b2_ref, o_ref):
    # matmul1: bf16 operands on the MXU, f32 accumulation. K = real input_size
    # (no K padding; the MXU is massively underutilized at these shapes anyway).
    x = x_ref[...].astype(jnp.bfloat16)
    h = jnp.dot(x, w1_ref[...], preferred_element_type=jnp.float32)
    # bias + ReLU in f32 on the VPU.
    h = jnp.maximum(h + b1_ref[...], 0.0)
    # matmul2: cast activations back to bf16 for the MXU, accumulate in f32.
    y = jnp.dot(h.astype(jnp.bfloat16), w2_ref[...],
                preferred_element_type=jnp.float32)
    # Only the real output columns exist in the out block (no padded writeback).
    o_ref[...] = y + b2_ref[...]


def prepare_params(w1, b1, w2, b2):
    """Pad / bf16-cast the Linear weights for the kernel.

    Call ONCE per weight update and cache the result (e.g. in the agent /
    train state). Do NOT rebuild per forward call.
      w1: (in, hid)  b1: (hid,)  w2: (hid, out)  b2: (out,)
    """
    in_size, hid_size = w1.shape
    hid2, out_size = w2.shape
    assert hid2 == hid_size
    hid_p = _round_up(hid_size, _LANE)  # lane-dense hidden dim; zero pad is exact
    w1p = jnp.zeros((in_size, hid_p), jnp.bfloat16).at[:, :hid_size].set(
        w1.astype(jnp.bfloat16))
    b1p = jnp.zeros((1, hid_p), jnp.float32).at[:, :hid_size].set(
        jnp.reshape(b1, (1, hid_size)).astype(jnp.float32))
    w2p = jnp.zeros((hid_p, out_size), jnp.bfloat16).at[:hid_size, :].set(
        w2.astype(jnp.bfloat16))
    b2p = jnp.reshape(b2, (1, out_size)).astype(jnp.float32)
    return w1p, b1p, w2p, b2p


def linear_qnet_forward(x, params, *, block_b=1024):
    """relu(x @ w1 + b1) @ w2 + b2 using pre-prepared params (prepare_params).

    x: (B, input_size) float32. Returns (B, output_size) float32.
    """
    w1p, b1p, w2p, b2p = params
    B, in_size = x.shape
    assert w1p.shape[0] == in_size
    hid_p = w1p.shape[1]
    out_size = w2p.shape[1]

    # Batch tile: multiple of 16 rows (bf16 sublane packing). For B >= 32 force
    # at least two tiles so the "parallel" grid axis shards over v7x's two
    # TensorCores (~0.35 us extra step overhead on single-TC v5e/v6e, which
    # otherwise prefer one big tile -- block_b caps the tile at 1024 rows).
    if B >= 2 * _BF16_SUBLANE:
        tb = min(block_b, _round_up(-(-B // 2), _BF16_SUBLANE))
    else:
        tb = _BF16_SUBLANE
    b_p = _round_up(B, tb)
    n_tiles = b_p // tb

    # Only the batch axis ever needs padding; feature dims stay at real size.
    xp = x if b_p == B else jnp.zeros((b_p, in_size), x.dtype).at[:B].set(x)

    flops = 2 * B * (in_size * hid_p + hid_p * out_size)
    bytes_accessed = (xp.size * xp.dtype.itemsize
                      + w1p.size * 2 + w2p.size * 2
                      + b1p.size * 4 + b2p.size * 4
                      + b_p * out_size * 4)

    out_padded = pl.pallas_call(
        _mlp_kernel,
        out_shape=jax.ShapeDtypeStruct((b_p, out_size), jnp.float32),
        grid=(n_tiles,),
        in_specs=[
            pl.BlockSpec((tb, in_size), lambda i: (i, 0)),     # x: batch-tiled, K unpadded
            pl.BlockSpec((in_size, hid_p), lambda i: (0, 0)),  # w1: resident
            pl.BlockSpec((1, hid_p), lambda i: (0, 0)),        # b1: resident
            pl.BlockSpec((hid_p, out_size), lambda i: (0, 0)), # w2: resident
            pl.BlockSpec((1, out_size), lambda i: (0, 0)),     # b2: resident
        ],
        out_specs=pl.BlockSpec((tb, out_size), lambda i: (i, 0)),
        compiler_params=pltpu.CompilerParams(
            dimension_semantics=("parallel",)),
        cost_estimate=pl.CostEstimate(
            flops=flops, transcendentals=0, bytes_accessed=bytes_accessed),
    )(xp, w1p, b1p, w2p, b2p)

    return out_padded if b_p == B else out_padded[:B]


def init_params(key, input_size, hidden_size, output_size):
    # Mimics PyTorch nn.Linear default init: U(-1/sqrt(fan_in), +1/sqrt(fan_in)).
    k1, k2, k3, k4 = jax.random.split(key, 4)
    bound1 = 1.0 / (input_size ** 0.5)
    bound2 = 1.0 / (hidden_size ** 0.5)
    w1 = jax.random.uniform(k1, (input_size, hidden_size), jnp.float32, -bound1, bound1)
    b1 = jax.random.uniform(k2, (hidden_size,), jnp.float32, -bound1, bound1)
    w2 = jax.random.uniform(k3, (hidden_size, output_size), jnp.float32, -bound2, bound2)
    b2 = jax.random.uniform(k4, (output_size,), jnp.float32, -bound2, bound2)
    return w1, b1, w2, b2


def _reference_bf16(x, w1, b1, w2, b2):
    # Same bf16-operand / f32-accumulate recipe as the kernel.
    h = jnp.dot(x.astype(jnp.bfloat16), w1.astype(jnp.bfloat16),
                preferred_element_type=jnp.float32) + jnp.reshape(b1, (1, -1))
    h = jnp.maximum(h, 0.0)
    return jnp.dot(h.astype(jnp.bfloat16), w2.astype(jnp.bfloat16),
                   preferred_element_type=jnp.float32) + jnp.reshape(b2, (1, -1))


if __name__ == "__main__":
    # Snake-game Q-net sizes: 11 state features, 32 hidden units, 3 actions.
    batch, input_size, hidden_size, output_size = 2, 11, 32, 3

    key = jax.random.PRNGKey(0)
    kx, kp = jax.random.split(key)
    x = jax.random.normal(kx, (batch, input_size), dtype=jnp.float32)
    w1, b1, w2, b2 = init_params(kp, input_size, hidden_size, output_size)

    # Prepare (pad + bf16 cast) the weights ONCE, then reuse across forwards.
    params = prepare_params(w1, b1, w2, b2)

    out = linear_qnet_forward(x, params)
    out = jax.block_until_ready(out)
    assert out.shape == (batch, output_size)

    # Tight check against a pure-JAX reference using the same bf16 matmul recipe.
    ref_bf16 = _reference_bf16(x, w1, b1, w2, b2)
    assert jnp.allclose(out, ref_bf16, atol=1e-3, rtol=1e-3)

    # Loose check against the full-f32 PyTorch-equivalent forward (bf16 rounding only).
    ref_f32 = jnp.maximum(x @ w1 + b1[None, :], 0.0) @ w2 + b2[None, :]
    assert jnp.allclose(out, ref_f32, atol=5e-2, rtol=5e-2)

    # A larger-batch call exercising the multi-tile (>=2 tiles) path.
    xb = jax.random.normal(kx, (100, input_size), dtype=jnp.float32)
    outb = jax.block_until_ready(linear_qnet_forward(xb, params))
    refb = _reference_bf16(xb, w1, b1, w2, b2)
    assert outb.shape == (100, output_size)
    assert jnp.allclose(outb, refb, atol=1e-3, rtol=1e-3)

    print("KERNEL_OK")
</pallas_src>

<mosaic_0001>
module attributes {stable_mosaic.version = 11 : i64} {
  func.func @_mlp_kernel(%arg0: i32, %arg1: memref<16x11xf32, #tpu.memory_space<vmem>>, %arg2: memref<11x128xbf16, #tpu.memory_space<vmem>>, %arg3: memref<1x128xf32, #tpu.memory_space<vmem>>, %arg4: memref<128x3xbf16, #tpu.memory_space<vmem>>, %arg5: memref<1x3xf32, #tpu.memory_space<vmem>>, %arg6: memref<16x3xf32, #tpu.memory_space<vmem>>) attributes {dimension_semantics = [#tpu.dimension_semantics<parallel>], iteration_bounds = array<i64: 1>, scalar_prefetch = 0 : i64, scratch_operands = 0 : i64, tpu.core_type = #tpu.core_type<tc>, window_params = [{transform_indices = @transform_0, window_bounds = array<i64: 16, 11>}, {pipeline_mode = #tpu.pipeline_mode<synchronous>, transform_indices = @transform_1, window_bounds = array<i64: 11, 128>}, {pipeline_mode = #tpu.pipeline_mode<synchronous>, transform_indices = @transform_2, window_bounds = array<i64: 1, 128>}, {pipeline_mode = #tpu.pipeline_mode<synchronous>, transform_indices = @transform_3, window_bounds = array<i64: 128, 3>}, {pipeline_mode = #tpu.pipeline_mode<synchronous>, transform_indices = @transform_4, window_bounds = array<i64: 1, 3>}, {transform_indices = @transform_5, window_bounds = array<i64: 16, 3>}]} {
    %c0 = arith.constant 0 : index
    %c0_0 = arith.constant 0 : index
    %0 = vector.load %arg1[%c0, %c0_0] : memref<16x11xf32, #tpu.memory_space<vmem>>, vector<16x11xf32>
    %1 = arith.truncf %0 : vector<16x11xf32> to vector<16x11xbf16>
    %c0_1 = arith.constant 0 : index
    %c0_2 = arith.constant 0 : index
    %2 = vector.load %arg2[%c0_1, %c0_2] : memref<11x128xbf16, #tpu.memory_space<vmem>>, vector<11x128xbf16>
    %cst = arith.constant dense<0.000000e+00> : vector<16x128xf32>
    %3 = tpu.matmul %1, %2, %cst {dimension_numbers = #tpu.dot_dimension_numbers<[1], [0], [0], [1], [0, 0, 1, 1], [], []>} : vector<16x11xbf16>, vector<11x128xbf16>, vector<16x128xf32> -> vector<16x128xf32>
    %c0_3 = arith.constant 0 : index
    %c0_4 = arith.constant 0 : index
    %4 = vector.load %arg3[%c0_3, %c0_4] : memref<1x128xf32, #tpu.memory_space<vmem>>, vector<1x128xf32>
    %5 = vector.broadcast %4 : vector<1x128xf32> to vector<16x128xf32>
    %6 = arith.addf %3, %5 : vector<16x128xf32>
    %cst_5 = arith.constant 0.000000e+00 : f32
    %7 = vector.broadcast %cst_5 : f32 to vector<16x128xf32>
    %8 = arith.maximumf %6, %7 : vector<16x128xf32>
    %9 = arith.truncf %8 : vector<16x128xf32> to vector<16x128xbf16>
    %c0_6 = arith.constant 0 : index
    %c0_7 = arith.constant 0 : index
    %10 = vector.load %arg4[%c0_6, %c0_7] : memref<128x3xbf16, #tpu.memory_space<vmem>>, vector<128x3xbf16>
    %cst_8 = arith.constant dense<0.000000e+00> : vector<16x3xf32>
    %11 = tpu.matmul %9, %10, %cst_8 {dimension_numbers = #tpu.dot_dimension_numbers<[1], [0], [0], [1], [0, 0, 1, 1], [], []>} : vector<16x128xbf16>, vector<128x3xbf16>, vector<16x3xf32> -> vector<16x3xf32>
    %c0_9 = arith.constant 0 : index
    %c0_10 = arith.constant 0 : index
    %12 = vector.load %arg5[%c0_9, %c0_10] : memref<1x3xf32, #tpu.memory_space<vmem>>, vector<1x3xf32>
    %13 = vector.broadcast %12 : vector<1x3xf32> to vector<16x3xf32>
    %14 = arith.addf %11, %13 : vector<16x3xf32>
    %c0_11 = arith.constant 0 : index
    %c0_12 = arith.constant 0 : index
    %15 = vector.load %arg6[%c0_11, %c0_12] : memref<16x3xf32, #tpu.memory_space<vmem>>, vector<16x3xf32>
    tpu.vector_store %arg6[%c0_11, %c0_12], %14 {strides = array<i32>} : memref<16x3xf32, #tpu.memory_space<vmem>>, vector<16x3xf32>,
    return
  }
  func.func @transform_0(%arg0: i32) -> (i32, i32) {
    %c0_i32 = arith.constant 0 : i32
    %c0_i32_0 = arith.constant 0 : i32
    return %arg0, %c0_i32 : i32, i32
  }
  func.func @transform_1(%arg0: i32) -> (i32, i32) {
    %c0_i32 = arith.constant 0 : i32
    %c0_i32_0 = arith.constant 0 : i32
    %c0_i32_1 = arith.constant 0 : i32
    return %c0_i32, %c0_i32_0 : i32, i32
  }
  func.func @transform_2(%arg0: i32) -> (i32, i32) {
    %c0_i32 = arith.constant 0 : i32
    %c0_i32_0 = arith.constant 0 : i32
    %c0_i32_1 = arith.constant 0 : i32
    return %c0_i32, %c0_i32_0 : i32, i32
  }
  func.func @transform_3(%arg0: i32) -> (i32, i32) {
    %c0_i32 = arith.constant 0 : i32
    %c0_i32_0 = arith.constant 0 : i32
    %c0_i32_1 = arith.constant 0 : i32
    return %c0_i32, %c0_i32_0 : i32, i32
  }
  func.func @transform_4(%arg0: i32) -> (i32, i32) {
    %c0_i32 = arith.constant 0 : i32
    %c0_i32_0 = arith.constant 0 : i32
    %c0_i32_1 = arith.constant 0 : i32
    return %c0_i32, %c0_i32_0 : i32, i32
  }
  func.func @transform_5(%arg0: i32) -> (i32, i32) {
    %c0_i32 = arith.constant 0 : i32
    %c0_i32_0 = arith.constant 0 : i32
    return %arg0, %c0_i32 : i32, i32
  }
}

</mosaic_0001>

<bundles_post_ra>
// kernel: tpu_custom_call.1
= control target key start
LH: loop header
LB: loop body
LE: loop exit
PB: predicated region body
PF: predicated region fallthrough
CT: control target
= control target key end

     0   :  { %vm39_vm0 = vcmask 1044480   ;;  %vm40_vm1 = vcmask 1045504   ;;  %v201_v2 = vmov 65535   ;;  %vm35_vm2 = vcmask 89088   ;;  %s280_s1 = inlined_call_operand.vmem [shape: bf16[11,128], index: 1, kind: input, shape index: {}]   ;;  %s281_s0 = inlined_call_operand.vmem [shape: f32[16,11], index: 0, kind: input, shape index: {}]   ;;  %s282_s3 = inlined_call_operand.vmem [shape: bf16[128,3], index: 3, kind: input, shape index: {}]   ;;  %s283_s2 = inlined_call_operand.vmem [shape: f32[1,128], index: 2, kind: input, shape index: {}]   ;;  %s284_s4 = inlined_call_operand.vmem [shape: f32[1,3], index: 4, kind: input, shape index: {}]   ;;  %s285_s5 = inlined_call_operand.vmem [shape: f32[16,3], index: 5, kind: output, shape index: {}]  }
   0x1   :  { %v154_v0 = vld [vmem:[%s280_s1] sm:$0xf]  ;;  %v189_v1 = vld [vmem:[%s280_s1] sm:$0x30]  ;;  %v41_v3 = vsel %vm39_vm0, 4294967295, %v201_v2  ;;  %v22_v7 = vld [vmem:[%s281_s0 + $0x8] sm:$0xff] }
   0x2   :  { %v155_v4 = vor.u32 %v189_v1, %v154_v0  ;;  %v42_v5 = vsel %vm40_vm1, %v41_v3, 0  ;;  %v21_v6 = vld [vmem:[%s281_s0] sm:$0xff]  ;;  %v197_v8 = vld [vmem:[%s282_s3 + $0x38] sm:$0xff]  ;;  %v196_v10 = vld [vmem:[%s282_s3 + $0x30] sm:$0xff]  ;;  %vm145_vm3 = vcmask 23552  }
   0x3   :  { %131 = vmatpush.bf16.msra.mxu1 %v197_v8  ;;  %v23_v11 = vpack.c.bf16 %v22_v7, %v21_v6  ;;  %v195_v12 = vld [vmem:[%s282_s3 + $0x28] sm:$0xff]  ;;  %v194_v13 = vld [vmem:[%s282_s3 + $0x20] sm:$0xff]  ;;  %v193_v14 = vld [vmem:[%s282_s3 + $0x18] sm:$0xff] }
   0x4   :  { %v44_v9 = vand.u32 %v155_v4, %v42_v5  ;;  %v192_v15 = vld [vmem:[%s282_s3 + $0x10] sm:$0xff]  ;;  %v191_v16 = vld [vmem:[%s282_s3 + $0x8] sm:$0xff]  ;;  %v190_v17 = vld [vmem:[%s282_s3] sm:$0xff] }
   0x5   :  { %v199_v19 = vld [vmem:[%s283_s2] ss:$0 sm:$0xff] }
   0x6   :  { %53 = vmatpush.bf16.msra.mxu0 %v44_v9  ;;  %v200_v26 = vld [vmem:[%s284_s4] ss:$0 sm:$0xff] }
   0x7   :  { %132 = vmatpush.bf16.msra.mxu1 %v196_v10 }
   0x9   :  { %156 = vmatmul.msk.bf16.vlgmr.msra.gmra.mxu0 %vm35_vm2, %v23_v11 }
   0xb   :  { %133 = vmatpush.bf16.msra.mxu1 %v195_v12 }
   0xf   :  { %134 = vmatpush.bf16.msra.mxu1 %v194_v13 }
  0x13   :  { %135 = vmatpush.bf16.msra.mxu1 %v193_v14 }
  0x17   :  { %136 = vmatpush.bf16.msra.mxu1 %v192_v15 }
  0x1b   :  { %137 = vmatpush.bf16.msra.mxu1 %v191_v16 }
  0x1f   :  { %138 = vmatpush.bf16.msra.mxu1 %v190_v17 }
  0x86   :  { %v55_v18 = vpop.f32.mrf.mxu0 }
  0x87   :  { %v56_v20 = vadd.f32 %v199_v19, %v55_v18 }
  0x89   :  { %v60_v23 = vmax.f32 %v56_v20, 0.0 }
  0x8e   :  { %v57_v21 = vpop.f32.mrf.mxu0 }
  0x8f   :  { %v58_v22 = vadd.f32 %v199_v19, %v57_v21 }
  0x91   :  { %v61_v24 = vmax.f32 %v58_v22, 0.0 }
  0x93   :  { %v62_v25 = vpack.c.bf16 %v61_v24, %v60_v23 }
  0x95   :  { %139 = vmatmul.bf16.vlgmr.msra.gmra.mxu1 %v62_v25 }
 0x112   :  { %v140_v27 = vpop.f32.mrf.mxu1 }
 0x113   :  { %v141_v28 = vadd.f32 %v200_v26, %v140_v27 }
 0x115   :  { %146 = vst.msk [vmem:[%s285_s5] sm:$0xff] %vm145_vm3, %v141_v28 }
 0x11a   :  { %v142_v29 = vpop.f32.mrf.mxu1 }
 0x11b   :  { %v143_v30 = vadd.f32 %v200_v26, %v142_v29 }
 0x11d   :  { %147 = vst.msk [vmem:[%s285_s5 + $0x8] sm:$0xff] %vm145_vm3, %v143_v30 }

</bundles_post_ra>
